<compile_context>
chip_gen: v7x
topology: tpu7x:2x2x1
jax: 0.10.0
libtpu: 0.0.40
codegen_flags: <defaults>
</compile_context>

<pallas_src>
import jax
import jax.numpy as jnp
from jax.experimental import pallas as pl
from jax.experimental.pallas import tpu as pltpu

LANE = 128


def _round_up(n, m):
    return ((n + m - 1) // m) * m


def mlp_kernel(x_ref, w1_ref, b1_ref, w2_ref, b2_ref, w3_ref, b3_ref,
               w4_ref, b4_ref, o_ref):
    """Fused fc1->relu->fc2->relu->fc3->relu->fc4 on one batch tile."""
    def mm(a, w_ref):
        w = w_ref[...]
        # bf16 (or f32) operands into the MXU, always accumulate in f32.
        return jnp.dot(a.astype(w.dtype), w, preferred_element_type=jnp.float32)

    x = x_ref[...]                                            # f32 [TB, D_in_pad]
    h = jnp.maximum(mm(x, w1_ref) + b1_ref[...], 0.0)         # relu(fc1)  [TB,128]
    h = jnp.maximum(mm(h, w2_ref) + b2_ref[...], 0.0)         # relu(fc2)  [TB,128]
    h = jnp.maximum(mm(h, w3_ref) + b3_ref[...], 0.0)         # relu(fc3)  [TB,128] (64 real + 64 zero)
    o_ref[...] = mm(h, w4_ref) + b4_ref[...]                  # fc4        [TB,128] (action_dim real)


def mlp_forward(x, params, *, block_batch=256, matmul_dtype=jnp.bfloat16):
    """params: dict with w1..w4 ([in,out], f32) and b1..b4 ([1,out], f32)."""
    batch, state_dim = x.shape
    action_dim = params["w4"].shape[1]

    d_in_pad = _round_up(max(state_dim, 8), 8)   # sublane-friendly K for fc1
    h3_pad = LANE                                # fc3 output 64 -> 128 (lane-dense)
    out_pad = LANE                               # action_dim   -> 128 (lane-dense store)

    def pad2(a, rows, cols):
        return jnp.pad(a, ((0, rows - a.shape[0]), (0, cols - a.shape[1])))

    # Zero-padding is exact: padded h3 columns are relu(0)=0 and hit zero rows of w4;
    # padded output columns are pure zeros and get sliced off below.
    w1 = pad2(params["w1"], d_in_pad, 128).astype(matmul_dtype)
    w2 = params["w2"].astype(matmul_dtype)
    w3 = pad2(params["w3"], 128, h3_pad).astype(matmul_dtype)
    w4 = pad2(params["w4"], h3_pad, out_pad).astype(matmul_dtype)
    b1 = params["b1"].astype(jnp.float32)
    b2 = params["b2"].astype(jnp.float32)
    b3 = pad2(params["b3"], 1, h3_pad).astype(jnp.float32)
    b4 = pad2(params["b4"], 1, out_pad).astype(jnp.float32)

    # Batch tile: keep it modest (fused 4-layer chain keeps h live); pad batch to a multiple.
    tb = min(block_batch, _round_up(batch, 8))
    batch_pad = _round_up(batch, tb)
    xp = jnp.pad(x.astype(jnp.float32),
                 ((0, batch_pad - batch), (0, d_in_pad - state_dim)))

    const = lambda a: pl.BlockSpec(a.shape, lambda i: (0, 0))  # VMEM-resident params

    out = pl.pallas_call(
        mlp_kernel,
        out_shape=jax.ShapeDtypeStruct((batch_pad, out_pad), jnp.float32),
        grid=(batch_pad // tb,),
        in_specs=[
            pl.BlockSpec((tb, d_in_pad), lambda i: (i, 0)),    # x: tiled over batch
            const(w1), const(b1), const(w2), const(b2),
            const(w3), const(b3), const(w4), const(b4),
        ],
        out_specs=pl.BlockSpec((tb, out_pad), lambda i: (i, 0)),
        compiler_params=pltpu.CompilerParams(
            dimension_semantics=("parallel",)),                # megacore on v7x
    )(xp, w1, b1, w2, b2, w3, b3, w4, b4)

    return out[:batch, :action_dim]


def init_params(key, state_dim, action_dim):
    """Deterministic init mimicking PyTorch nn.Linear default (U[-1/sqrt(fan_in), 1/sqrt(fan_in)])."""
    dims = [(state_dim, 128), (128, 128), (128, 64), (64, action_dim)]
    params = {}
    for i, (fan_in, fan_out) in enumerate(dims, start=1):
        key, kw, kb = jax.random.split(key, 3)
        bound = 1.0 / jnp.sqrt(jnp.float32(fan_in))
        params[f"w{i}"] = jax.random.uniform(
            kw, (fan_in, fan_out), jnp.float32, minval=-bound, maxval=bound)
        params[f"b{i}"] = jax.random.uniform(
            kb, (1, fan_out), jnp.float32, minval=-bound, maxval=bound)
    return params


def reference_forward(x, params, matmul_dtype=jnp.float32):
    """Pure-JAX reference; matmul_dtype lets us match the kernel's bf16 MXU inputs."""
    def lin(h, w, b):
        return jnp.dot(h.astype(matmul_dtype), w.astype(matmul_dtype),
                       preferred_element_type=jnp.float32) + b
    h = jnp.maximum(lin(x, params["w1"], params["b1"]), 0.0)
    h = jnp.maximum(lin(h, params["w2"], params["b2"]), 0.0)
    h = jnp.maximum(lin(h, params["w3"], params["b3"]), 0.0)
    return lin(h, params["w4"], params["b4"])


if __name__ == "__main__":
    key = jax.random.PRNGKey(0)
    batch, state_dim, action_dim = 2, 4, 2  # CartPole-like dims (DQN acting path)

    key, kx = jax.random.split(key)
    x = jax.random.normal(kx, (batch, state_dim), jnp.float32)
    params = init_params(key, state_dim, action_dim)

    out = jax.block_until_ready(mlp_forward(x, params))
    assert out.shape == (batch, action_dim)

    # Tight check vs reference with identical bf16 MXU inputs.
    ref_bf16 = reference_forward(x, params, matmul_dtype=jnp.bfloat16)
    assert jnp.allclose(out, ref_bf16, atol=2e-3, rtol=2e-3), "mismatch vs bf16-matched reference"
    # Loose check vs full-f32 reference (bf16 operand rounding only).
    ref_f32 = reference_forward(x, params, matmul_dtype=jnp.float32)
    assert jnp.allclose(out, ref_f32, atol=5e-2, rtol=5e-2), "mismatch vs f32 reference"

    # Exercise the batch grid with a non-divisible, multi-tile batch.
    key, kx2 = jax.random.split(key)
    x_big = jax.random.normal(kx2, (300, state_dim), jnp.float32)
    out_big = jax.block_until_ready(mlp_forward(x_big, params))
    ref_big = reference_forward(x_big, params, matmul_dtype=jnp.bfloat16)
    assert out_big.shape == (300, action_dim)
    assert jnp.allclose(out_big, ref_big, atol=2e-3, rtol=2e-3), "mismatch on multi-tile batch"

    print("KERNEL_OK")
</pallas_src>

<mosaic_0001>
module attributes {stable_mosaic.version = 11 : i64} {
  func.func @mlp_kernel(%arg0: i32, %arg1: memref<8x8xf32, #tpu.memory_space<vmem>>, %arg2: memref<8x128xbf16, #tpu.memory_space<vmem>>, %arg3: memref<1x128xf32, #tpu.memory_space<vmem>>, %arg4: memref<128x128xbf16, #tpu.memory_space<vmem>>, %arg5: memref<1x128xf32, #tpu.memory_space<vmem>>, %arg6: memref<128x128xbf16, #tpu.memory_space<vmem>>, %arg7: memref<1x128xf32, #tpu.memory_space<vmem>>, %arg8: memref<128x128xbf16, #tpu.memory_space<vmem>>, %arg9: memref<1x128xf32, #tpu.memory_space<vmem>>, %arg10: memref<8x128xf32, #tpu.memory_space<vmem>>) attributes {dimension_semantics = [#tpu.dimension_semantics<parallel>], iteration_bounds = array<i64: 1>, scalar_prefetch = 0 : i64, scratch_operands = 0 : i64, tpu.core_type = #tpu.core_type<tc>, window_params = [{transform_indices = @transform_0, window_bounds = array<i64: 8, 8>}, {pipeline_mode = #tpu.pipeline_mode<synchronous>, transform_indices = @transform_1, window_bounds = array<i64: 8, 128>}, {pipeline_mode = #tpu.pipeline_mode<synchronous>, transform_indices = @transform_2, window_bounds = array<i64: 1, 128>}, {pipeline_mode = #tpu.pipeline_mode<synchronous>, transform_indices = @transform_3, window_bounds = array<i64: 128, 128>}, {pipeline_mode = #tpu.pipeline_mode<synchronous>, transform_indices = @transform_4, window_bounds = array<i64: 1, 128>}, {pipeline_mode = #tpu.pipeline_mode<synchronous>, transform_indices = @transform_5, window_bounds = array<i64: 128, 128>}, {pipeline_mode = #tpu.pipeline_mode<synchronous>, transform_indices = @transform_6, window_bounds = array<i64: 1, 128>}, {pipeline_mode = #tpu.pipeline_mode<synchronous>, transform_indices = @transform_7, window_bounds = array<i64: 128, 128>}, {pipeline_mode = #tpu.pipeline_mode<synchronous>, transform_indices = @transform_8, window_bounds = array<i64: 1, 128>}, {transform_indices = @transform_9, window_bounds = array<i64: 8, 128>}]} {
    %c0 = arith.constant 0 : index
    %c0_0 = arith.constant 0 : index
    %0 = vector.load %arg1[%c0, %c0_0] : memref<8x8xf32, #tpu.memory_space<vmem>>, vector<8x8xf32>
    %c0_1 = arith.constant 0 : index
    %c0_2 = arith.constant 0 : index
    %1 = vector.load %arg2[%c0_1, %c0_2] : memref<8x128xbf16, #tpu.memory_space<vmem>>, vector<8x128xbf16>
    %2 = arith.truncf %0 : vector<8x8xf32> to vector<8x8xbf16>
    %cst = arith.constant dense<0.000000e+00> : vector<8x128xf32>
    %3 = tpu.matmul %2, %1, %cst {dimension_numbers = #tpu.dot_dimension_numbers<[1], [0], [0], [1], [0, 0, 1, 1], [], []>} : vector<8x8xbf16>, vector<8x128xbf16>, vector<8x128xf32> -> vector<8x128xf32>
    %c0_3 = arith.constant 0 : index
    %c0_4 = arith.constant 0 : index
    %4 = vector.load %arg3[%c0_3, %c0_4] : memref<1x128xf32, #tpu.memory_space<vmem>>, vector<1x128xf32>
    %5 = vector.broadcast %4 : vector<1x128xf32> to vector<8x128xf32>
    %6 = arith.addf %3, %5 : vector<8x128xf32>
    %cst_5 = arith.constant 0.000000e+00 : f32
    %7 = vector.broadcast %cst_5 : f32 to vector<8x128xf32>
    %8 = arith.maximumf %6, %7 : vector<8x128xf32>
    %c0_6 = arith.constant 0 : index
    %c0_7 = arith.constant 0 : index
    %9 = vector.load %arg4[%c0_6, %c0_7] : memref<128x128xbf16, #tpu.memory_space<vmem>>, vector<128x128xbf16>
    %10 = arith.truncf %8 : vector<8x128xf32> to vector<8x128xbf16>
    %cst_8 = arith.constant dense<0.000000e+00> : vector<8x128xf32>
    %11 = tpu.matmul %10, %9, %cst_8 {dimension_numbers = #tpu.dot_dimension_numbers<[1], [0], [0], [1], [0, 0, 1, 1], [], []>} : vector<8x128xbf16>, vector<128x128xbf16>, vector<8x128xf32> -> vector<8x128xf32>
    %c0_9 = arith.constant 0 : index
    %c0_10 = arith.constant 0 : index
    %12 = vector.load %arg5[%c0_9, %c0_10] : memref<1x128xf32, #tpu.memory_space<vmem>>, vector<1x128xf32>
    %13 = vector.broadcast %12 : vector<1x128xf32> to vector<8x128xf32>
    %14 = arith.addf %11, %13 : vector<8x128xf32>
    %cst_11 = arith.constant 0.000000e+00 : f32
    %15 = vector.broadcast %cst_11 : f32 to vector<8x128xf32>
    %16 = arith.maximumf %14, %15 : vector<8x128xf32>
    %c0_12 = arith.constant 0 : index
    %c0_13 = arith.constant 0 : index
    %17 = vector.load %arg6[%c0_12, %c0_13] : memref<128x128xbf16, #tpu.memory_space<vmem>>, vector<128x128xbf16>
    %18 = arith.truncf %16 : vector<8x128xf32> to vector<8x128xbf16>
    %cst_14 = arith.constant dense<0.000000e+00> : vector<8x128xf32>
    %19 = tpu.matmul %18, %17, %cst_14 {dimension_numbers = #tpu.dot_dimension_numbers<[1], [0], [0], [1], [0, 0, 1, 1], [], []>} : vector<8x128xbf16>, vector<128x128xbf16>, vector<8x128xf32> -> vector<8x128xf32>
    %c0_15 = arith.constant 0 : index
    %c0_16 = arith.constant 0 : index
    %20 = vector.load %arg7[%c0_15, %c0_16] : memref<1x128xf32, #tpu.memory_space<vmem>>, vector<1x128xf32>
    %21 = vector.broadcast %20 : vector<1x128xf32> to vector<8x128xf32>
    %22 = arith.addf %19, %21 : vector<8x128xf32>
    %cst_17 = arith.constant 0.000000e+00 : f32
    %23 = vector.broadcast %cst_17 : f32 to vector<8x128xf32>
    %24 = arith.maximumf %22, %23 : vector<8x128xf32>
    %c0_18 = arith.constant 0 : index
    %c0_19 = arith.constant 0 : index
    %25 = vector.load %arg8[%c0_18, %c0_19] : memref<128x128xbf16, #tpu.memory_space<vmem>>, vector<128x128xbf16>
    %26 = arith.truncf %24 : vector<8x128xf32> to vector<8x128xbf16>
    %cst_20 = arith.constant dense<0.000000e+00> : vector<8x128xf32>
    %27 = tpu.matmul %26, %25, %cst_20 {dimension_numbers = #tpu.dot_dimension_numbers<[1], [0], [0], [1], [0, 0, 1, 1], [], []>} : vector<8x128xbf16>, vector<128x128xbf16>, vector<8x128xf32> -> vector<8x128xf32>
    %c0_21 = arith.constant 0 : index
    %c0_22 = arith.constant 0 : index
    %28 = vector.load %arg9[%c0_21, %c0_22] : memref<1x128xf32, #tpu.memory_space<vmem>>, vector<1x128xf32>
    %29 = vector.broadcast %28 : vector<1x128xf32> to vector<8x128xf32>
    %30 = arith.addf %27, %29 : vector<8x128xf32>
    %c0_23 = arith.constant 0 : index
    %c0_24 = arith.constant 0 : index
    %31 = vector.load %arg10[%c0_23, %c0_24] : memref<8x128xf32, #tpu.memory_space<vmem>>, vector<8x128xf32>
    tpu.vector_store %arg10[%c0_23, %c0_24], %30 {strides = array<i32>} : memref<8x128xf32, #tpu.memory_space<vmem>>, vector<8x128xf32>,
    return
  }
  func.func @transform_0(%arg0: i32) -> (i32, i32) {
    %c0_i32 = arith.constant 0 : i32
    %c0_i32_0 = arith.constant 0 : i32
    return %arg0, %c0_i32 : i32, i32
  }
  func.func @transform_1(%arg0: i32) -> (i32, i32) {
    %c0_i32 = arith.constant 0 : i32
    %c0_i32_0 = arith.constant 0 : i32
    %c0_i32_1 = arith.constant 0 : i32
    return %c0_i32, %c0_i32_0 : i32, i32
  }
  func.func @transform_2(%arg0: i32) -> (i32, i32) {
    %c0_i32 = arith.constant 0 : i32
    %c0_i32_0 = arith.constant 0 : i32
    %c0_i32_1 = arith.constant 0 : i32
    return %c0_i32, %c0_i32_0 : i32, i32
  }
  func.func @transform_3(%arg0: i32) -> (i32, i32) {
    %c0_i32 = arith.constant 0 : i32
    %c0_i32_0 = arith.constant 0 : i32
    %c0_i32_1 = arith.constant 0 : i32
    return %c0_i32, %c0_i32_0 : i32, i32
  }
  func.func @transform_4(%arg0: i32) -> (i32, i32) {
    %c0_i32 = arith.constant 0 : i32
    %c0_i32_0 = arith.constant 0 : i32
    %c0_i32_1 = arith.constant 0 : i32
    return %c0_i32, %c0_i32_0 : i32, i32
  }
  func.func @transform_5(%arg0: i32) -> (i32, i32) {
    %c0_i32 = arith.constant 0 : i32
    %c0_i32_0 = arith.constant 0 : i32
    %c0_i32_1 = arith.constant 0 : i32
    return %c0_i32, %c0_i32_0 : i32, i32
  }
  func.func @transform_6(%arg0: i32) -> (i32, i32) {
    %c0_i32 = arith.constant 0 : i32
    %c0_i32_0 = arith.constant 0 : i32
    %c0_i32_1 = arith.constant 0 : i32
    return %c0_i32, %c0_i32_0 : i32, i32
  }
  func.func @transform_7(%arg0: i32) -> (i32, i32) {
    %c0_i32 = arith.constant 0 : i32
    %c0_i32_0 = arith.constant 0 : i32
    %c0_i32_1 = arith.constant 0 : i32
    return %c0_i32, %c0_i32_0 : i32, i32
  }
  func.func @transform_8(%arg0: i32) -> (i32, i32) {
    %c0_i32 = arith.constant 0 : i32
    %c0_i32_0 = arith.constant 0 : i32
    %c0_i32_1 = arith.constant 0 : i32
    return %c0_i32, %c0_i32_0 : i32, i32
  }
  func.func @transform_9(%arg0: i32) -> (i32, i32) {
    %c0_i32 = arith.constant 0 : i32
    %c0_i32_0 = arith.constant 0 : i32
    return %arg0, %c0_i32 : i32, i32
  }
}

</mosaic_0001>

<bundles_post_ra>
// kernel: tpu_custom_call.1
= control target key start
LH: loop header
LB: loop body
LE: loop exit
PB: predicated region body
PF: predicated region fallthrough
CT: control target
= control target key end

     0   :  { %14 = vsyncpa [#allocation3], 0  ;;  %s997_s0 = inlined_call_operand.hbm [shape: f32[8,8], index: 0, kind: input, shape index: {}]   ;;  %s998_s1 = inlined_call_operand.hbm [shape: bf16[8,128], index: 1, kind: input, shape index: {}]   ;;  %s999_s2 = inlined_call_operand.vmem [shape: f32[1,128], index: 2, kind: input, shape index: {}]   ;;  %s1000_s3 = inlined_call_operand.hbm [shape: bf16[128,128], index: 3, kind: input, shape index: {}]   ;;  %s1001_s4 = inlined_call_operand.vmem [shape: f32[1,128], index: 4, kind: input, shape index: {}]   ;;  %s1002_s5 = inlined_call_operand.hbm [shape: bf16[128,128], index: 5, kind: input, shape index: {}]   ;;  %s1003_s6 = inlined_call_operand.vmem [shape: f32[1,128], index: 6, kind: input, shape index: {}]   ;;  %s1004_s7 = inlined_call_operand.hbm [shape: bf16[128,128], index: 7, kind: input, shape index: {}]   ;;  %s1005_s8 = inlined_call_operand.vmem [shape: f32[1,128], index: 8, kind: input, shape index: {}]   ;;  %s1006_s9 = inlined_call_operand.hbm [shape: f32[8,128], index: 9, kind: output, shape index: {}]  }
   0x1   :  { %15 = vsyncpa [#allocation6], 0 }
   0x2   :  { %16 = vsyncpa [#allocation9], 0 }
   0x3   :  { %17 = vsyncpa [#allocation4], 0  ;;  %s811_s30 = smov [#allocation5]   ;;  %s671_s13 = scalar_lea.hbm %s998_s1, 64 }
   0x4   :  { %s34_s10 = sshll.u32 %s811_s30, 4  ;;  %p672_p0 = scmp.ne.s32.totalorder %s998_s1, %s671_s13  ;;  %s35_s10 = int_to_ptr.vmem [resolvable:$true] %s34_s10 }
   0x5   :  { %p675_p1 = scmp.lt.u32.totalorder %s671_s13, %s998_s1 }
   0x7   :  { %p677_p2 = pnand %p675_p1, %p672_p0 }
   0x9   :  { %680 = shalt.err (!%p677_p2)
}
   0xa   :  { %s681_s18 = scalar_lea.vmem %s35_s10, 64  ;;  %p686_p4 = scmp.lt.s32.totalorder %s35_s10, %s35_s10 }
   0xb   :  { %p682_p3 = scmp.ne.s32.totalorder %s35_s10, %s681_s18  ;;  %p687_p5 = scmp.lt.s32.totalorder %s681_s18, %s681_s18 }
   0xd   :  { %p688_p6 = por %p687_p5, %p686_p4 }
   0xf   :  { %p689_p7 = pnand %p688_p6, %p682_p3 }
  0x11   :  { %692 = shalt.err (!%p689_p7)
}
  0x12   :  { %37 = dma.hbm_to_vmem [thread:$0]  %s998_s1, 64, %s35_s10, [#allocation6]  }
  0x13   :  { %s812_s21 = smov [#allocation8]   ;;  %s813_s23 = smov [#allocation2]  }
  0x14   :  { %s59_s22 = sshll.u32 %s812_s21, 4  ;;  %s24_s24 = sshll.u32 %s813_s23, 4  ;;  %s60_s22 = int_to_ptr.vmem [resolvable:$true] %s59_s22  ;;  %s25_s24 = int_to_ptr.vmem [resolvable:$true] %s24_s24 }
  0x15   :  { %s693_s27 = scalar_lea.hbm %s1002_s5, 1024 }
  0x16   :  { %p694_p8 = scmp.ne.s32.totalorder %s1002_s5, %s693_s27  ;;  %p697_p9 = scmp.lt.u32.totalorder %s693_s27, %s1002_s5 }
  0x18   :  { %p699_p10 = pnand %p697_p9, %p694_p8 }
  0x1a   :  { %702 = shalt.err (!%p699_p10)
}
  0x1b   :  { %s703_s1 = scalar_lea.vmem %s60_s22, 1024  ;;  %p708_p12 = scmp.lt.s32.totalorder %s60_s22, %s60_s22 }
  0x1c   :  { %p704_p11 = scmp.ne.s32.totalorder %s60_s22, %s703_s1  ;;  %p709_p13 = scmp.lt.s32.totalorder %s703_s1, %s703_s1 }
  0x1e   :  { %p710_p0 = por %p709_p13, %p708_p12 }
  0x20   :  { %p711_p1 = pnand %p710_p0, %p704_p11 }
  0x22   :  { %714 = shalt.err (!%p711_p1)
}
  0x23   :  { %s814_s10 = smov 64   ;;  %s815_s12 = smov 4  }
  0x24   :  { %65 = dma.hbm_to_vmem [thread:$0]  %s1002_s5, 1024, %s60_s22, [#allocation9], %s814_s10, %s814_s10, %s815_s12  }
  0x25   :  { %s715_s17 = scalar_lea.hbm %s997_s0, 128 }
  0x26   :  { %p716_p2 = scmp.ne.s32.totalorder %s997_s0, %s715_s17  ;;  %p719_p3 = scmp.lt.u32.totalorder %s715_s17, %s997_s0 }
  0x28   :  { %p721_p4 = pnand %p719_p3, %p716_p2 }
  0x2a   :  { %724 = shalt.err (!%p721_p4)
}
  0x2b   :  { %s725_s23 = scalar_lea.vmem %s25_s24, 128  ;;  %p730_p6 = scmp.lt.s32.totalorder %s25_s24, %s25_s24 }
  0x2c   :  { %p726_p5 = scmp.ne.s32.totalorder %s25_s24, %s725_s23  ;;  %p731_p7 = scmp.lt.s32.totalorder %s725_s23, %s725_s23 }
  0x2e   :  { %p732_p8 = por %p731_p7, %p730_p6 }
  0x30   :  { %p733_p9 = pnand %p732_p8, %p726_p5 }
  0x32   :  { %736 = shalt.err (!%p733_p9)
}
  0x33   :  { %27 = dma.hbm_to_vmem [thread:$0]  %s997_s0, 128, %s25_s24, [#allocation3]  }
  0x34   :  { %s816_s25 = smov [#allocation7]   ;;  %s817_s27 = smov [#allocation10]  }
  0x35   :  { %s45_s26 = sshll.u32 %s816_s25, 4  ;;  %s73_s28 = sshll.u32 %s817_s27, 4  ;;  %s46_s26 = int_to_ptr.vmem [resolvable:$true] %s45_s26  ;;  %s74_s28 = int_to_ptr.vmem [resolvable:$true] %s73_s28 }
  0x36   :  { %s737_s11 = scalar_lea.hbm %s1000_s3, 1024 }
  0x37   :  { %p738_p10 = scmp.ne.s32.totalorder %s1000_s3, %s737_s11  ;;  %p741_p11 = scmp.lt.u32.totalorder %s737_s11, %s1000_s3 }
  0x39   :  { %p743_p12 = pnand %p741_p11, %p738_p10 }
  0x3b   :  { %746 = shalt.err (!%p743_p12)
}
  0x3c   :  { %s747_s0 = scalar_lea.vmem %s46_s26, 1024  ;;  %p752_p0 = scmp.lt.s32.totalorder %s46_s26, %s46_s26 }
  0x3d   :  { %p748_p13 = scmp.ne.s32.totalorder %s46_s26, %s747_s0  ;;  %p753_p1 = scmp.lt.s32.totalorder %s747_s0, %s747_s0 }
  0x3f   :  { %p754_p2 = por %p753_p1, %p752_p0 }
  0x41   :  { %p755_p3 = pnand %p754_p2, %p748_p13 }
  0x43   :  { %758 = shalt.err (!%p755_p3)
}
  0x44   :  { %51 = dma.hbm_to_vmem [thread:$0]  %s1000_s3, 1024, %s46_s26, [#allocation6], %s814_s10, %s814_s10, %s815_s12  }
  0x45   :  { %s759_s19 = scalar_lea.hbm %s1004_s7, 1024 }
  0x46   :  { %p760_p4 = scmp.ne.s32.totalorder %s1004_s7, %s759_s19  ;;  %p763_p5 = scmp.lt.u32.totalorder %s759_s19, %s1004_s7 }
  0x48   :  { %p765_p6 = pnand %p763_p5, %p760_p4 }
  0x4a   :  { %768 = shalt.err (!%p765_p6)
}
  0x4b   :  { %s769_s22 = scalar_lea.vmem %s74_s28, 1024  ;;  %p774_p8 = scmp.lt.s32.totalorder %s74_s28, %s74_s28 }
  0x4c   :  { %p770_p7 = scmp.ne.s32.totalorder %s74_s28, %s769_s22  ;;  %p775_p9 = scmp.lt.s32.totalorder %s769_s22, %s769_s22 }
  0x4e   :  { %p776_p10 = por %p775_p9, %p774_p8 }
  0x50   :  { %p777_p11 = pnand %p776_p10, %p770_p7 }
  0x52   :  { %780 = shalt.err (!%p777_p11)
}
  0x53   :  { %79 = dma.hbm_to_vmem [thread:$0]  %s1004_s7, 1024, %s74_s28, [#allocation9], %s814_s10, %s814_s10, %s815_s12  }
  0x54   :  { %803 = dma.done.wait [#allocation3], 128  }
  0x55   :  { %804 = vsyncadd [#allocation3], 4294967168 }
  0x56   :  { %805 = dma.done.wait [#allocation6], 1088  }
  0x57   :  { %806 = vsyncadd [#allocation6], 4294966208 }
  0x58   :  { %807 = dma.done.wait [#allocation9], 2048  }
  0x59   :  { %808 = vsyncadd [#allocation9], 4294965248  ;;  %v818_v0 = vmov 0.0   ;;  %vm819_vm0 = vmmov 0   ;;  %vm112_vm1 = vcmask 1043456   ;;  %v98_v2 = vld [vmem:[#allocation2] sm:$0xff] }
  0x5a   :  { %571 = vmatprep.subr.bf16.mxu0 %v818_v0  ;;  %573 = vmatprep.mubr.msk.bf16.mxu0 %vm819_vm0, %v818_v0  ;;  %v99_v1 = vld [vmem:[#allocation5] sm:$0xf]  ;;  %v100_v4 = vpack.c.bf16 %v98_v2, %v98_v2  ;;  %v647_v5 = vld [vmem:[#allocation7] sm:$0xff]   ;;  %vm108_vm2 = vcmask 64512   ;;  %v648_v6 = vld [vmem:[#allocation7 + $0x8] sm:$0xff]   ;;  %s820_s29 = smov [#allocation11]  }
  0x5b   :  { %577 = vmatprep.subr.bf16.mxu1 %v818_v0  ;;  %593 = vmatprep.mubr.msk.bf16.mxu1 %vm819_vm0, %v818_v0  ;;  %v114_v3 = vsel %vm112_vm1, %v99_v1, 0  ;;  %v649_v7 = vld [vmem:[#allocation7 + $0x10] sm:$0xff]   ;;  %v650_v8 = vld [vmem:[#allocation7 + $0x18] sm:$0xff]   ;;  %v651_v9 = vld [vmem:[#allocation7 + $0x20] sm:$0xff]   ;;  %s502_s30 = sshll.u32 %s820_s29, 4  ;;  %s503_s30 = int_to_ptr.vmem [resolvable:$true] %s502_s30 }
  0x5c   :  { %572 = vmatpush3.bf16.msra.mxu0 %v114_v3  ;;  %578 = vmatpush3.bf16.msra.mxu1 %v647_v5  ;;  %v652_v10 = vld [vmem:[#allocation7 + $0x28] sm:$0xff]   ;;  %v653_v11 = vld [vmem:[#allocation7 + $0x30] sm:$0xff]   ;;  %v654_v12 = vld [vmem:[#allocation7 + $0x38] sm:$0xff]   ;;  %p786_p13 = scmp.lt.s32.totalorder %s503_s30, %s503_s30 }
  0x5d   :  { %597 = vmatprep.subr.bf16.mxu0 %v818_v0  ;;  %579 = vmatprep.subr.bf16.mxu1 %v818_v0  ;;  %v655_v13 = vld [vmem:[#allocation8] sm:$0xff]   ;;  %v656_v14 = vld [vmem:[#allocation8 + $0x8] sm:$0xff]   ;;  %v657_v15 = vld [vmem:[#allocation8 + $0x10] sm:$0xff]  }
  0x5e   :  { %v658_v16 = vld [vmem:[#allocation8 + $0x18] sm:$0xff]   ;;  %v659_v17 = vld [vmem:[#allocation8 + $0x20] sm:$0xff]   ;;  %v660_v18 = vld [vmem:[#allocation8 + $0x28] sm:$0xff]  }
  0x5f   :  { %574 = vmatmul.mubr.msk.bf16.vlgmr.msra.gmra.mrb[0].mxu0 %vm108_vm2, %v100_v4  ;;  %v513_v19 = vld [vmem:[%s999_s2] ss:$0 sm:$0xff]  ;;  %v662_v28 = vld [vmem:[#allocation8 + $0x38] sm:$0xff]   ;;  %v663_v29 = vld [vmem:[#allocation10] sm:$0xff]  }
  0x60   :  { %613 = vmatprep.mubr.msk.bf16.mxu0 %vm819_vm0, %v818_v0  ;;  %580 = vmatpush3.bf16.msra.mxu1 %v648_v6  ;;  %v661_v27 = vld [vmem:[#allocation8 + $0x30] sm:$0xff]   ;;  %v664_v30 = vld [vmem:[#allocation10 + $0x8] sm:$0xff]   ;;  %v666_v32 = vld [vmem:[#allocation10 + $0x18] sm:$0xff]  }
  0x61   :  { %581 = vmatprep.subr.bf16.mxu1 %v818_v0  ;;  %598 = vmatpush3.bf16.msra.mxu0 %v655_v13  ;;  %v665_v31 = vld [vmem:[#allocation10 + $0x10] sm:$0xff]   ;;  %v667_v33 = vld [vmem:[#allocation10 + $0x20] sm:$0xff]   ;;  %v668_v34 = vld [vmem:[#allocation10 + $0x28] sm:$0xff]  }
  0x62   :  { %599 = vmatprep.subr.bf16.mxu0 %v818_v0  ;;  %v515_v35 = vld [vmem:[%s1001_s4] ss:$0 sm:$0xff]  ;;  %v670_v44 = vld [vmem:[#allocation10 + $0x38] sm:$0xff]  }
  0x63   :  { %v669_v43 = vld [vmem:[#allocation10 + $0x30] sm:$0xff]  }
  0x64   :  { %582 = vmatpush3.bf16.msra.mxu1 %v649_v7  ;;  %v524_v45 = vld [vmem:[%s1003_s6] ss:$0 sm:$0xff]  ;;  %s781_s6 = scalar_lea.vmem %s503_s30, 128 }
  0x65   :  { %583 = vmatprep.subr.bf16.mxu1 %v818_v0  ;;  %600 = vmatpush3.bf16.msra.mxu0 %v656_v14  ;;  %v533_v53 = vld [vmem:[%s1005_s8] ss:$0 sm:$0xff]  ;;  %p782_p12 = scmp.ne.s32.totalorder %s503_s30, %s781_s6  ;;  %p787_p0 = scmp.lt.s32.totalorder %s781_s6, %s781_s6 }
  0x66   :  { %601 = vmatprep.subr.bf16.mxu0 %v818_v0 }
  0x67   :  { %p788_p1 = por %p787_p0, %p786_p13 }
  0x68   :  { %584 = vmatpush3.bf16.msra.mxu1 %v650_v8 }
  0x69   :  { %585 = vmatprep.subr.bf16.mxu1 %v818_v0  ;;  %602 = vmatpush3.bf16.msra.mxu0 %v657_v15  ;;  %p789_p2 = pnand %p788_p1, %p782_p12 }
  0x6a   :  { %603 = vmatprep.subr.bf16.mxu0 %v818_v0 }
  0x6c   :  { %586 = vmatpush3.bf16.msra.mxu1 %v651_v9 }
  0x6d   :  { %587 = vmatprep.subr.bf16.mxu1 %v818_v0  ;;  %604 = vmatpush3.bf16.msra.mxu0 %v658_v16 }
  0x6e   :  { %605 = vmatprep.subr.bf16.mxu0 %v818_v0 }
  0x70   :  { %588 = vmatpush3.bf16.msra.mxu1 %v652_v10 }
  0x71   :  { %589 = vmatprep.subr.bf16.mxu1 %v818_v0  ;;  %606 = vmatpush3.bf16.msra.mxu0 %v659_v17 }
  0x72   :  { %607 = vmatprep.subr.bf16.mxu0 %v818_v0 }
  0x74   :  { %590 = vmatpush3.bf16.msra.mxu1 %v653_v11 }
  0x75   :  { %591 = vmatprep.subr.bf16.mxu1 %v818_v0  ;;  %608 = vmatpush3.bf16.msra.mxu0 %v660_v18 }
  0x76   :  { %609 = vmatprep.subr.bf16.mxu0 %v818_v0 }
  0x78   :  { %592 = vmatpush3.bf16.msra.mxu1 %v654_v12 }
  0x79   :  { %617 = vmatprep.subr.bf16.mxu1 %v818_v0  ;;  %610 = vmatpush3.bf16.msra.mxu0 %v661_v27 }
  0x7a   :  { %611 = vmatprep.subr.bf16.mxu0 %v818_v0 }
  0x7d   :  { %612 = vmatpush3.bf16.msra.mxu0 %v662_v28 }
 0x132   :  { %v150_v20 = vpop.f32.mrb[0].mxu0 }
 0x133   :  { %v151_v21 = vadd.f32 %v513_v19, %v150_v20  ;;  %v575_v22 = vpop.f32.mrb[1].mxu0 }
 0x134   :  { %v153_v23 = vpop.f32.mrb[2].mxu0 }
 0x135   :  { %v156_v24 = vmax.f32 %v151_v21, 0.0  ;;  %v576_v25 = vpop.f32.mrb[3].mxu0 }
 0x137   :  { %v173_v26 = vpack.c.bf16 %v156_v24, %v156_v24 }
 0x139   :  { %594 = vmatmul.mubr.bf16.vlgmr.msra.gmra.mrb[0].mxu1 %v173_v26 }
 0x13a   :  { %633 = vmatprep.mubr.msk.bf16.mxu1 %vm819_vm0, %v818_v0  ;;  %618 = vmatpush3.bf16.msra.mxu1 %v663_v29 }
 0x13b   :  { %619 = vmatprep.subr.bf16.mxu1 %v818_v0 }
 0x13e   :  { %620 = vmatpush3.bf16.msra.mxu1 %v664_v30 }
 0x13f   :  { %621 = vmatprep.subr.bf16.mxu1 %v818_v0 }
 0x142   :  { %622 = vmatpush3.bf16.msra.mxu1 %v665_v31 }
 0x143   :  { %623 = vmatprep.subr.bf16.mxu1 %v818_v0 }
 0x146   :  { %624 = vmatpush3.bf16.msra.mxu1 %v666_v32 }
 0x147   :  { %625 = vmatprep.subr.bf16.mxu1 %v818_v0 }
 0x14a   :  { %626 = vmatpush3.bf16.msra.mxu1 %v667_v33 }
 0x14b   :  { %627 = vmatprep.subr.bf16.mxu1 %v818_v0 }
 0x14e   :  { %628 = vmatpush3.bf16.msra.mxu1 %v668_v34 }
 0x14f   :  { %629 = vmatprep.subr.bf16.mxu1 %v818_v0 }
 0x152   :  { %630 = vmatpush3.bf16.msra.mxu1 %v669_v43 }
 0x153   :  { %631 = vmatprep.subr.bf16.mxu1 %v818_v0 }
 0x156   :  { %632 = vmatpush3.bf16.msra.mxu1 %v670_v44 }
 0x20c   :  { %v263_v36 = vpop.f32.mrb[0].mxu1 }
 0x20d   :  { %v264_v37 = vadd.f32 %v515_v35, %v263_v36  ;;  %v595_v38 = vpop.f32.mrb[1].mxu1 }
 0x20e   :  { %v266_v39 = vpop.f32.mrb[2].mxu1 }
 0x20f   :  { %v269_v40 = vmax.f32 %v264_v37, 0.0  ;;  %v596_v41 = vpop.f32.mrb[3].mxu1 }
 0x211   :  { %v286_v42 = vpack.c.bf16 %v269_v40, %v269_v40 }
 0x213   :  { %614 = vmatmul.mubr.bf16.vlgmr.msra.gmra.mrb[4].mxu0 %v286_v42 }
 0x2e6   :  { %v376_v46 = vpop.f32.mrb[4].mxu0 }
 0x2e7   :  { %v377_v47 = vadd.f32 %v524_v45, %v376_v46  ;;  %v615_v48 = vpop.f32.mrb[5].mxu0 }
 0x2e8   :  { %v379_v49 = vpop.f32.mrb[6].mxu0 }
 0x2e9   :  { %v382_v50 = vmax.f32 %v377_v47, 0.0  ;;  %v616_v51 = vpop.f32.mrb[7].mxu0 }
 0x2eb   :  { %v399_v52 = vpack.c.bf16 %v382_v50, %v382_v50 }
 0x2ed   :  { %634 = vmatmul.mubr.bf16.vlgmr.msra.gmra.mrb[4].mxu1 %v399_v52 }
 0x3c0   :  { %v489_v54 = vpop.f32.mrb[4].mxu1 }
 0x3c1   :  { %v490_v55 = vadd.f32 %v533_v53, %v489_v54  ;;  %v635_v56 = vpop.f32.mrb[5].mxu1 }
 0x3c2   :  { %v492_v57 = vpop.f32.mrb[6].mxu1 }
 0x3c3   :  { %495 = vst [vmem:[#allocation11] sm:$0xff] %v490_v55  ;;  %v636_v58 = vpop.f32.mrb[7].mxu1 }
 0x3c4   :  { %792 = shalt.err (!%p789_p2)
}
 0x3c5   :  { %s793_s8 = scalar_lea.hbm %s1006_s9, 128 }
 0x3c6   :  { %p794_p3 = scmp.ne.s32.totalorder %s1006_s9, %s793_s8  ;;  %p797_p4 = scmp.lt.u32.totalorder %s793_s8, %s1006_s9 }
 0x3c8   :  { %p799_p5 = pnand %p797_p4, %p794_p3 }
 0x3ca   :  { %802 = shalt.err (!%p799_p5)
}
 0x3cb   :  { %505 = dma.vmem_to_hbm [thread:$0]  %s503_s30, 128, %s1006_s9, [#allocation4]  }
 0x3cc   :  { %809 = dma.done.wait [#allocation4], 128  }
 0x3cd   :  { %810 = vsyncadd [#allocation4], 4294967168 }
 0x3ce   :  { %509 = vsyncpa [#allocation3], 1 }
 0x3cf   :  { %510 = vsyncpa [#allocation6], 1 }
 0x3d0   :  { %511 = vsyncpa [#allocation9], 1 }
 0x3d1   :  { %512 = vsyncpa [#allocation4], 1 }

</bundles_post_ra>
